<compile_context>
chip_gen: v7x
topology: tpu7x:2x2x1
jax: 0.10.0
libtpu: 0.0.40
codegen_flags: <defaults>
</compile_context>

<pallas_src>
import jax
import jax.numpy as jnp
from jax.experimental import pallas as pl
from jax.experimental.pallas import tpu as pltpu


def charlie_kernel(x_ref, w1_ref, b1_ref, w2_ref, b2_ref, w3t_ref, b3_ref,
                   rf_ref, alpha_ref, o_ref):
    # Selection already folded into w1_eff (= one_hot_sel @ w1), so
    # h1 = x @ w1_eff + b1 is equivalent to (index_select(x) @ w1 + b1).
    x = x_ref[...]
    h1 = jnp.dot(x, w1_ref[...], preferred_element_type=jnp.float32) + b1_ref[...]
    h1 = jnp.maximum(h1, 0.0)

    h2 = jnp.dot(h1, w2_ref[...], preferred_element_type=jnp.float32) + b2_ref[...]
    h2 = jnp.maximum(h2, 0.0)

    # Width-1 output layer on the VPU/XLU (multiply + cross-lane reduce)
    # instead of an N=1 MXU matmul.  w3t is (1, H2).
    ann = jnp.sum(h2 * w3t_ref[...], axis=-1, keepdims=True) + b3_ref[...]

    # output = alpha * rf_preds + (1 - alpha) * ann_preds
    alpha = alpha_ref[0, 0]
    one_minus = 1.0 - alpha
    o_ref[...] = alpha * rf_ref[...] + one_minus * ann


def charlie_forward(x, w1_eff, b1, w2, b2, w3_t, b3, rf_preds, alpha,
                    *, max_block_b=512):
    """x: (B, D), w1_eff: (D, H1), w2: (H1, H2), w3_t: (1, H2), rf_preds: (B, 1)."""
    B, D = x.shape
    H1 = w1_eff.shape[1]
    H2 = w2.shape[1]

    # Batch tile: whole batch if small; otherwise 512-row blocks (multiple of 8),
    # padding the batch so the grid divides evenly.  Weights stay fully VMEM
    # resident across all grid steps.
    tb = B if B <= max_block_b else max_block_b
    nb = pl.cdiv(B, tb)
    b_pad = nb * tb
    if b_pad != B:
        x = jnp.pad(x, ((0, b_pad - B), (0, 0)))
        rf_preds = jnp.pad(rf_preds, ((0, b_pad - B), (0, 0)))

    resident = pl.BlockSpec(memory_space=pltpu.MemorySpace.VMEM)

    flops = 2 * b_pad * (D * H1 + H1 * H2 + H2) + 4 * b_pad
    bytes_accessed = 4 * (b_pad * D          # x
                          + D * H1 + H1      # w1_eff, b1
                          + H1 * H2 + H2     # w2, b2
                          + H2 + 1           # w3_t, b3
                          + b_pad + 1        # rf_preds, alpha
                          + b_pad)           # output

    out = pl.pallas_call(
        charlie_kernel,
        out_shape=jax.ShapeDtypeStruct((b_pad, 1), jnp.float32),
        grid=(nb,),
        in_specs=[
            pl.BlockSpec((tb, D), lambda i: (i, 0)),             # x (batch-tiled)
            resident,                                            # w1_eff
            resident,                                            # b1
            resident,                                            # w2
            resident,                                            # b2
            resident,                                            # w3_t
            resident,                                            # b3
            pl.BlockSpec((tb, 1), lambda i: (i, 0)),             # rf_preds
            pl.BlockSpec(memory_space=pltpu.MemorySpace.SMEM),   # alpha scalar
        ],
        out_specs=pl.BlockSpec((tb, 1), lambda i: (i, 0)),
        compiler_params=pltpu.CompilerParams(
            dimension_semantics=("parallel",)),
        cost_estimate=pl.CostEstimate(
            flops=flops, transcendentals=0, bytes_accessed=bytes_accessed),
    )(x, w1_eff, b1, w2, b2, w3_t, b3, rf_preds, alpha)

    return out[:B]


def _linear_init(key, fan_in, fan_out):
    # Mirrors torch.nn.Linear default init: U(-1/sqrt(fan_in), 1/sqrt(fan_in))
    kw, kb = jax.random.split(key)
    bound = 1.0 / jnp.sqrt(jnp.float32(fan_in))
    w = jax.random.uniform(kw, (fan_in, fan_out), jnp.float32, -bound, bound)
    b = jax.random.uniform(kb, (1, fan_out), jnp.float32, -bound, bound)
    return w, b


if __name__ == "__main__":
    # Small shapes consistent with the module's defaults.
    B = 8                 # batch
    D = 16                # input_dim
    F = 5                 # selected_features
    H1, H2 = 32, 16       # hidden_layers=(32, 16)
    ALPHA = 0.5           # regression head -> output dim 1

    key = jax.random.PRNGKey(0)
    kx, k1, k2, k3 = jax.random.split(key, 4)

    x = jax.random.normal(kx, (B, D), jnp.float32)

    # Deterministic "top features" (RF feature importances are not translatable).
    top_features = jnp.array([3, 7, 1, 12, 5], dtype=jnp.int32)
    sel = jnp.zeros((D, F), jnp.float32).at[top_features, jnp.arange(F)].set(1.0)

    # MLP parameters (deterministic init).
    w1, b1 = _linear_init(k1, F, H1)
    w2, b2 = _linear_init(k2, H1, H2)
    w3, b3 = _linear_init(k3, H2, 1)

    # Prep-time folds (exact): selection matrix into w1, transpose w3 for the
    # VPU-side output layer.
    w1_eff = sel @ w1          # (D, H1)
    w3_t = w3.T                # (1, H2)

    # Synthetic surrogate for sklearn RF regression predictions, shape (B, 1).
    # TODO(synk): real RandomForestRegressor.predict has no Pallas equivalent.
    rf_preds = jnp.mean(x, axis=1, keepdims=True).astype(jnp.float32)

    alpha = jnp.full((1, 1), ALPHA, jnp.float32)

    out = charlie_forward(x, w1_eff, b1, w2, b2, w3_t, b3, rf_preds, alpha)
    out = jax.block_until_ready(out)

    # Sanity check against a pure-JAX reference of the same forward.
    x_sel = x[:, top_features]
    h1 = jnp.maximum(x_sel @ w1 + b1, 0.0)
    h2 = jnp.maximum(h1 @ w2 + b2, 0.0)
    ann = h2 @ w3 + b3
    ref = ALPHA * rf_preds + (1.0 - ALPHA) * ann
    assert out.shape == (B, 1)
    assert jnp.allclose(out, ref, atol=1e-5, rtol=1e-5)

    print("KERNEL_OK")
</pallas_src>

<mosaic_0001>
module attributes {stable_mosaic.version = 11 : i64} {
  func.func @charlie_kernel(%arg0: i32, %arg1: memref<8x16xf32, #tpu.memory_space<vmem>>, %arg2: memref<16x32xf32, #tpu.memory_space<vmem>>, %arg3: memref<1x32xf32, #tpu.memory_space<vmem>>, %arg4: memref<32x16xf32, #tpu.memory_space<vmem>>, %arg5: memref<1x16xf32, #tpu.memory_space<vmem>>, %arg6: memref<1x16xf32, #tpu.memory_space<vmem>>, %arg7: memref<1x1xf32, #tpu.memory_space<vmem>>, %arg8: memref<8x1xf32, #tpu.memory_space<vmem>>, %arg9: memref<1x1xf32, #tpu.memory_space<smem>>, %arg10: memref<8x1xf32, #tpu.memory_space<vmem>>) attributes {dimension_semantics = [#tpu.dimension_semantics<parallel>], iteration_bounds = array<i64: 1>, scalar_prefetch = 0 : i64, scratch_operands = 0 : i64, tpu.core_type = #tpu.core_type<tc>, window_params = [{transform_indices = @transform_0, window_bounds = array<i64: 8, 16>}, {pipeline_mode = #tpu.pipeline_mode<synchronous>, transform_indices = @transform_1, window_bounds = array<i64: 16, 32>}, {pipeline_mode = #tpu.pipeline_mode<synchronous>, transform_indices = @transform_2, window_bounds = array<i64: 1, 32>}, {pipeline_mode = #tpu.pipeline_mode<synchronous>, transform_indices = @transform_3, window_bounds = array<i64: 32, 16>}, {pipeline_mode = #tpu.pipeline_mode<synchronous>, transform_indices = @transform_4, window_bounds = array<i64: 1, 16>}, {pipeline_mode = #tpu.pipeline_mode<synchronous>, transform_indices = @transform_5, window_bounds = array<i64: 1, 16>}, {pipeline_mode = #tpu.pipeline_mode<synchronous>, transform_indices = @transform_6, window_bounds = array<i64: 1, 1>}, {transform_indices = @transform_7, window_bounds = array<i64: 8, 1>}, {transform_indices = @transform_8, window_bounds = array<i64: 1, 1>}, {transform_indices = @transform_9, window_bounds = array<i64: 8, 1>}]} {
    %c0 = arith.constant 0 : index
    %c0_0 = arith.constant 0 : index
    %0 = vector.load %arg1[%c0, %c0_0] : memref<8x16xf32, #tpu.memory_space<vmem>>, vector<8x16xf32>
    %c0_1 = arith.constant 0 : index
    %c0_2 = arith.constant 0 : index
    %1 = vector.load %arg2[%c0_1, %c0_2] : memref<16x32xf32, #tpu.memory_space<vmem>>, vector<16x32xf32>
    %cst = arith.constant dense<0.000000e+00> : vector<8x32xf32>
    %2 = tpu.matmul %0, %1, %cst {dimension_numbers = #tpu.dot_dimension_numbers<[1], [0], [0], [1], [0, 0, 1, 1], [], []>} : vector<8x16xf32>, vector<16x32xf32>, vector<8x32xf32> -> vector<8x32xf32>
    %c0_3 = arith.constant 0 : index
    %c0_4 = arith.constant 0 : index
    %3 = vector.load %arg3[%c0_3, %c0_4] : memref<1x32xf32, #tpu.memory_space<vmem>>, vector<1x32xf32>
    %4 = vector.broadcast %3 : vector<1x32xf32> to vector<8x32xf32>
    %5 = arith.addf %2, %4 : vector<8x32xf32>
    %cst_5 = arith.constant 0.000000e+00 : f32
    %6 = vector.broadcast %cst_5 : f32 to vector<8x32xf32>
    %7 = arith.maximumf %5, %6 : vector<8x32xf32>
    %c0_6 = arith.constant 0 : index
    %c0_7 = arith.constant 0 : index
    %8 = vector.load %arg4[%c0_6, %c0_7] : memref<32x16xf32, #tpu.memory_space<vmem>>, vector<32x16xf32>
    %cst_8 = arith.constant dense<0.000000e+00> : vector<8x16xf32>
    %9 = tpu.matmul %7, %8, %cst_8 {dimension_numbers = #tpu.dot_dimension_numbers<[1], [0], [0], [1], [0, 0, 1, 1], [], []>} : vector<8x32xf32>, vector<32x16xf32>, vector<8x16xf32> -> vector<8x16xf32>
    %c0_9 = arith.constant 0 : index
    %c0_10 = arith.constant 0 : index
    %10 = vector.load %arg5[%c0_9, %c0_10] : memref<1x16xf32, #tpu.memory_space<vmem>>, vector<1x16xf32>
    %11 = vector.broadcast %10 : vector<1x16xf32> to vector<8x16xf32>
    %12 = arith.addf %9, %11 : vector<8x16xf32>
    %cst_11 = arith.constant 0.000000e+00 : f32
    %13 = vector.broadcast %cst_11 : f32 to vector<8x16xf32>
    %14 = arith.maximumf %12, %13 : vector<8x16xf32>
    %c0_12 = arith.constant 0 : index
    %c0_13 = arith.constant 0 : index
    %15 = vector.load %arg6[%c0_12, %c0_13] : memref<1x16xf32, #tpu.memory_space<vmem>>, vector<1x16xf32>
    %16 = vector.broadcast %15 : vector<1x16xf32> to vector<8x16xf32>
    %17 = arith.mulf %14, %16 : vector<8x16xf32>
    %cst_14 = arith.constant dense<0.000000e+00> : vector<8xf32>
    %18 = vector.multi_reduction <add>, %17, %cst_14 [1] : vector<8x16xf32> to vector<8xf32>
    %19 = vector.shape_cast %18 : vector<8xf32> to vector<8x1xf32>
    %c0_15 = arith.constant 0 : index
    %c0_16 = arith.constant 0 : index
    %20 = vector.load %arg7[%c0_15, %c0_16] : memref<1x1xf32, #tpu.memory_space<vmem>>, vector<1x1xf32>
    %21 = vector.broadcast %20 : vector<1x1xf32> to vector<8x1xf32>
    %22 = arith.addf %19, %21 : vector<8x1xf32>
    %c0_17 = arith.constant 0 : index
    %c0_18 = arith.constant 0 : index
    %23 = memref.load %arg9[%c0_17, %c0_18] : memref<1x1xf32, #tpu.memory_space<smem>>
    %cst_19 = arith.constant 1.000000e+00 : f32
    %24 = arith.subf %cst_19, %23 : f32
    %c0_20 = arith.constant 0 : index
    %c0_21 = arith.constant 0 : index
    %25 = vector.load %arg8[%c0_20, %c0_21] : memref<8x1xf32, #tpu.memory_space<vmem>>, vector<8x1xf32>
    %26 = vector.broadcast %23 : f32 to vector<8x1xf32>
    %27 = arith.mulf %26, %25 : vector<8x1xf32>
    %28 = vector.broadcast %24 : f32 to vector<8x1xf32>
    %29 = arith.mulf %28, %22 : vector<8x1xf32>
    %30 = arith.addf %27, %29 : vector<8x1xf32>
    %c0_22 = arith.constant 0 : index
    %c0_23 = arith.constant 0 : index
    %31 = vector.load %arg10[%c0_22, %c0_23] : memref<8x1xf32, #tpu.memory_space<vmem>>, vector<8x1xf32>
    tpu.vector_store %arg10[%c0_22, %c0_23], %30 {strides = array<i32>} : memref<8x1xf32, #tpu.memory_space<vmem>>, vector<8x1xf32>,
    return
  }
  func.func @transform_0(%arg0: i32) -> (i32, i32) {
    %c0_i32 = arith.constant 0 : i32
    %c0_i32_0 = arith.constant 0 : i32
    return %arg0, %c0_i32 : i32, i32
  }
  func.func @transform_1(%arg0: i32) -> (i32, i32) {
    %c0_i32 = arith.constant 0 : i32
    %c0_i32_0 = arith.constant 0 : i32
    %c0_i32_1 = arith.constant 0 : i32
    return %c0_i32, %c0_i32_0 : i32, i32
  }
  func.func @transform_2(%arg0: i32) -> (i32, i32) {
    %c0_i32 = arith.constant 0 : i32
    %c0_i32_0 = arith.constant 0 : i32
    %c0_i32_1 = arith.constant 0 : i32
    return %c0_i32, %c0_i32_0 : i32, i32
  }
  func.func @transform_3(%arg0: i32) -> (i32, i32) {
    %c0_i32 = arith.constant 0 : i32
    %c0_i32_0 = arith.constant 0 : i32
    %c0_i32_1 = arith.constant 0 : i32
    return %c0_i32, %c0_i32_0 : i32, i32
  }
  func.func @transform_4(%arg0: i32) -> (i32, i32) {
    %c0_i32 = arith.constant 0 : i32
    %c0_i32_0 = arith.constant 0 : i32
    %c0_i32_1 = arith.constant 0 : i32
    return %c0_i32, %c0_i32_0 : i32, i32
  }
  func.func @transform_5(%arg0: i32) -> (i32, i32) {
    %c0_i32 = arith.constant 0 : i32
    %c0_i32_0 = arith.constant 0 : i32
    %c0_i32_1 = arith.constant 0 : i32
    return %c0_i32, %c0_i32_0 : i32, i32
  }
  func.func @transform_6(%arg0: i32) -> (i32, i32) {
    %c0_i32 = arith.constant 0 : i32
    %c0_i32_0 = arith.constant 0 : i32
    %c0_i32_1 = arith.constant 0 : i32
    return %c0_i32, %c0_i32_0 : i32, i32
  }
  func.func @transform_7(%arg0: i32) -> (i32, i32) {
    %c0_i32 = arith.constant 0 : i32
    %c0_i32_0 = arith.constant 0 : i32
    return %arg0, %c0_i32 : i32, i32
  }
  func.func @transform_8(%arg0: i32) -> (i32, i32) {
    %c0_i32 = arith.constant 0 : i32
    %c0_i32_0 = arith.constant 0 : i32
    %c0_i32_1 = arith.constant 0 : i32
    return %c0_i32, %c0_i32_0 : i32, i32
  }
  func.func @transform_9(%arg0: i32) -> (i32, i32) {
    %c0_i32 = arith.constant 0 : i32
    %c0_i32_0 = arith.constant 0 : i32
    return %arg0, %c0_i32 : i32, i32
  }
}

</mosaic_0001>

<bundles_post_ra>
// kernel: tpu_custom_call.1
= control target key start
LH: loop header
LB: loop body
LE: loop exit
PB: predicated region body
PF: predicated region fallthrough
CT: control target
= control target key end

     0   :  { %v283_v0 = vmov 0.0|0.0   ;;  %vm284_vm0 = vmmov 0   ;;  %v285_v3 = vmov 0.0   ;;  %vm45_vm1 = vcmask 130048   ;;  %s383_s1 = inlined_call_operand.vmem [shape: f32[16,32], index: 1, kind: input, shape index: {}]   ;;  %s384_s3 = inlined_call_operand.vmem [shape: f32[32,16], index: 3, kind: input, shape index: {}]   ;;  %s385_s0 = inlined_call_operand.vmem [shape: f32[8,16], index: 0, kind: input, shape index: {}]   ;;  %s386_s2 = inlined_call_operand.vmem [shape: f32[1,32], index: 2, kind: input, shape index: {}]   ;;  %s387_s6 = inlined_call_operand.<no memory space> [shape: f32[1,1], index: 6, kind: input, shape index: {}]   ;;  %s388_s4 = inlined_call_operand.vmem [shape: f32[1,16], index: 4, kind: input, shape index: {}]   ;;  %s389_s5 = inlined_call_operand.vmem [shape: f32[1,16], index: 5, kind: input, shape index: {}]   ;;  %s390_s8 = inlined_call_operand.<no memory space> [shape: f32[1,1], index: 8, kind: input, shape index: {}]   ;;  %s391_s7 = inlined_call_operand.vmem [shape: f32[8,1], index: 7, kind: input, shape index: {}]   ;;  %s392_s9 = inlined_call_operand.vmem [shape: f32[8,1], index: 9, kind: output, shape index: {}]  }
   0x1   :  { %271 = vmatprep.subr.bf16.mxu0 %v283_v0  ;;  %v36_v1 = vld [vmem:[%s383_s1] sm:$0xff]  ;;  %v37_v2 = vld [vmem:[%s383_s1 + $0x8] sm:$0xff]  ;;  %257 = vmatprep.mubr.msk.f32.mxu0 %vm284_vm0, %v285_v3  ;;  %v122_v9 = vld [vmem:[%s384_s3 + $0x10] sm:$0xff]  ;;  %vm131_vm2 = vcmask 261120   ;;  %v14_v17 = vstv %s387_s6  ;;  %s226_s6 = ssub.f32 1.0, %s390_s8  ;;  %vm233_vm3 = vcmask 7168  }
   0x2   :  { %v272_v4 = vpack.c.bf16 %v37_v2, %v36_v1  ;;  %274 = vmatprep.subr.bf16.mxu1 %v283_v0  ;;  %v120_v5 = vld [vmem:[%s384_s3] sm:$0xff]  ;;  %v121_v6 = vld [vmem:[%s384_s3 + $0x8] sm:$0xff]  ;;  %268 = vmatprep.mubr.msk.f32.mxu1 %vm284_vm0, %v285_v3  ;;  %v123_v10 = vld [vmem:[%s384_s3 + $0x18] sm:$0xff]  ;;  %15 = vst [vmem:[#allocation2] sm:$0x1] %v14_v17  ;;  %v228_v28 = vstv %s390_s8 }
   0x3   :  { %v275_v7 = vpack.c.bf16 %v121_v6, %v120_v5  ;;  %v35_v8 = vld [vmem:[%s385_s0] sm:$0xff]  ;;  %v278_v11 = vpack.c.bf16 %v123_v10, %v122_v9  ;;  %v230_v30 = vstv %s226_s6 }
   0x4   :  { %273 = vmatpush3.bf16.msra.mxu0 %v272_v4  ;;  %v239_v12 = vld [vmem:[%s386_s2] ss:$0 sm:$0xff] }
   0x5   :  { %276 = vmatpush3.bf16.msra.mxu1 %v275_v7  ;;  %v241_v18 = vld [vmem:[%s388_s4] ss:$0 sm:$0xff] }
   0x6   :  { %277 = vmatprep.subr.bf16.mxu1 %v283_v0  ;;  %v243_v22 = vld [vmem:[%s389_s5] ss:$0 sm:$0xff] }
   0x7   :  { %258 = vmatmul.mubr.msk.f32.vlgmr.msra.gmra.mrb[0].mxu0 %vm45_vm1, %v35_v8  ;;  %v227_v27 = vld [vmem:[%s391_s7] sm:$0xff] }
   0x8   :  { %v229_v32 = vmul.f32 %v228_v28, %v227_v27 }
   0x9   :  { %279 = vmatpush3.bf16.msra.mxu1 %v278_v11  ;;  %v244_v26 = vld [vmem:[#allocation2] ss:$0 sm:$0xff] }
  0xda   :  { %v115_v13 = vpop.f32.mrb[0].mxu0 }
  0xdb   :  { %v116_v14 = vadd.f32 %v239_v12, %v115_v13  ;;  %v259_v15 = vpop.f32.mrb[1].mxu0 }
  0xdd   :  { %v119_v16 = vmax.f32 %v116_v14, 0.0 }
  0xdf   :  { %269 = vmatmul.mubr.msk.f32.vlgmr.msra.gmra.mrb[0].mxu1 %vm131_vm2, %v119_v16 }
 0x1b2   :  { %v201_v19 = vpop.f32.mrb[0].mxu1 }
 0x1b3   :  { %v202_v20 = vadd.f32 %v241_v18, %v201_v19  ;;  %v270_v21 = vpop.f32.mrb[1].mxu1 }
 0x1b5   :  { %v205_v23 = vmax.f32 %v202_v20, 0.0 }
 0x1b7   :  { %v213_v24 = vmul.f32 %v243_v22, %v205_v23 }
 0x1b9   :  { %v214_v25 = vsel %vm45_vm1, %v213_v24, 0.0 }
 0x1ba   :  { %215 = vadd.xlane.f32.xlu0 %v214_v25 }
 0x247   :  { %v216_v29 = vpop.xlane.xlu0 %215 }
 0x248   :  { %v224_v31 = vadd.f32 %v244_v26, %v216_v29 }
 0x24a   :  { %v231_v33 = vmul.f32 %v230_v30, %v224_v31 }
 0x24c   :  { %v232_v34 = vadd.f32 %v231_v33, %v229_v32 }
 0x24e   :  { %234 = vst.msk [vmem:[%s392_s9] sm:$0xff] %vm233_vm3, %v232_v34 }

</bundles_post_ra>
